<compile_context>
chip_gen: v5e
topology: v5e:2x2
jax: 0.10.0
libtpu: 0.0.40
codegen_flags: <defaults>
</compile_context>

<pallas_src>
import functools

import jax
import jax.numpy as jnp
from jax.experimental import pallas as pl
from jax.experimental.pallas import tpu as pltpu

NEG_INF = -1e9


# ----------------------------------------------------------------------------
# Tiling helper
# ----------------------------------------------------------------------------
def _pick_tile(dim, target, align):
    """Largest tile <= target that divides dim and is a multiple of align; else dim."""
    if dim <= target:
        return dim
    t = (target // align) * align
    while t >= align:
        if dim % t == 0:
            return t
        t -= align
    return dim


# ----------------------------------------------------------------------------
# Tiled matmul (+bias, +optional activation) kernel
# ----------------------------------------------------------------------------
def _matmul_kernel(x_ref, w_ref, b_ref, o_ref, acc_ref, *, act):
    @pl.when(pl.program_id(2) == 0)
    def _():
        acc_ref[...] = jnp.zeros_like(acc_ref)

    acc_ref[...] += jnp.dot(x_ref[...].astype(jnp.bfloat16), w_ref[...],
                            preferred_element_type=jnp.float32)

    @pl.when(pl.program_id(2) == pl.num_programs(2) - 1)
    def _():
        y = acc_ref[...] + b_ref[...]
        if act == "gelu":
            y = jax.nn.gelu(y)
        elif act == "relu":
            y = jnp.maximum(y, 0.0)
        o_ref[...] = y.astype(o_ref.dtype)


def linear(x, w, b, act="none", out_dtype=jnp.bfloat16, *, tm=256, tn=512, tk=512):
    # x: (M, K) bf16/f32   w: (K, N) bf16   b: (N,) f32
    M, K = x.shape
    N = w.shape[1]
    tm = _pick_tile(M, tm, 16)
    tn = _pick_tile(N, tn, 128)
    tk = _pick_tile(K, tk, 128)
    grid = (M // tm, N // tn, K // tk)
    return pl.pallas_call(
        functools.partial(_matmul_kernel, act=act),
        grid=grid,
        in_specs=[
            pl.BlockSpec((tm, tk), lambda i, j, k: (i, k)),
            pl.BlockSpec((tk, tn), lambda i, j, k: (k, j)),
            pl.BlockSpec((1, tn), lambda i, j, k: (0, j)),
        ],
        out_specs=pl.BlockSpec((tm, tn), lambda i, j, k: (i, j)),
        out_shape=jax.ShapeDtypeStruct((M, N), out_dtype),
        scratch_shapes=[pltpu.VMEM((tm, tn), jnp.float32)],
        compiler_params=pltpu.CompilerParams(
            dimension_semantics=("parallel", "parallel", "arbitrary")),
    )(x, w, b.reshape(1, N))


# ----------------------------------------------------------------------------
# Tied LM head: x (M,H) @ emb(V,H)^T without materializing the transpose
# ----------------------------------------------------------------------------
def _lm_head_kernel(x_ref, e_ref, b_ref, o_ref, acc_ref):
    @pl.when(pl.program_id(2) == 0)
    def _():
        acc_ref[...] = jnp.zeros_like(acc_ref)

    acc_ref[...] += jax.lax.dot_general(
        x_ref[...].astype(jnp.bfloat16), e_ref[...],
        (((1,), (1,)), ((), ())), preferred_element_type=jnp.float32)

    @pl.when(pl.program_id(2) == pl.num_programs(2) - 1)
    def _():
        o_ref[...] = (acc_ref[...] + b_ref[...]).astype(o_ref.dtype)


def lm_head(x, emb, b, *, tm=256, tn=512, tk=512):
    # x: (M, H) bf16   emb: (V, H) bf16   b: (V,) f32
    M, H = x.shape
    V = emb.shape[0]
    tm = _pick_tile(M, tm, 16)
    tn = _pick_tile(V, tn, 128)
    tk = _pick_tile(H, tk, 128)
    grid = (M // tm, V // tn, H // tk)
    return pl.pallas_call(
        _lm_head_kernel,
        grid=grid,
        in_specs=[
            pl.BlockSpec((tm, tk), lambda i, j, k: (i, k)),
            pl.BlockSpec((tn, tk), lambda i, j, k: (j, k)),
            pl.BlockSpec((1, tn), lambda i, j, k: (0, j)),
        ],
        out_specs=pl.BlockSpec((tm, tn), lambda i, j, k: (i, j)),
        out_shape=jax.ShapeDtypeStruct((M, V), jnp.float32),
        scratch_shapes=[pltpu.VMEM((tm, tn), jnp.float32)],
        compiler_params=pltpu.CompilerParams(
            dimension_semantics=("parallel", "parallel", "arbitrary")),
    )(x, emb, b.reshape(1, V))


# ----------------------------------------------------------------------------
# Fused FFN: y = act(x @ w1 + b1) @ w2 + b2   (intermediate never leaves VMEM)
# ----------------------------------------------------------------------------
def _ffn_kernel(x_ref, w1_ref, b1_ref, w2_ref, b2_ref, o_ref, acc_ref, *, act):
    f = pl.program_id(1)

    @pl.when(f == 0)
    def _():
        acc_ref[...] = jnp.zeros_like(acc_ref)

    h = jnp.dot(x_ref[...].astype(jnp.bfloat16), w1_ref[...],
                preferred_element_type=jnp.float32) + b1_ref[...]
    if act == "gelu":
        h = jax.nn.gelu(h)
    else:
        h = jnp.maximum(h, 0.0)
    acc_ref[...] += jnp.dot(h.astype(jnp.bfloat16), w2_ref[...],
                            preferred_element_type=jnp.float32)

    @pl.when(f == pl.num_programs(1) - 1)
    def _():
        o_ref[...] = (acc_ref[...] + b2_ref[...]).astype(o_ref.dtype)


def ffn(x, w1, b1, w2, b2, act, out_dtype=jnp.bfloat16, *, tm=256, tf=512):
    # x: (M, H) bf16   w1: (H, F) bf16   w2: (F, H) bf16
    M, H = x.shape
    F = w1.shape[1]
    tm = _pick_tile(M, tm, 16)
    tf = _pick_tile(F, tf, 128)
    grid = (M // tm, F // tf)
    return pl.pallas_call(
        functools.partial(_ffn_kernel, act=act),
        grid=grid,
        in_specs=[
            pl.BlockSpec((tm, H), lambda i, f: (i, 0)),
            pl.BlockSpec((H, tf), lambda i, f: (0, f)),
            pl.BlockSpec((1, tf), lambda i, f: (0, f)),
            pl.BlockSpec((tf, H), lambda i, f: (f, 0)),
            pl.BlockSpec((1, H), lambda i, f: (0, 0)),
        ],
        out_specs=pl.BlockSpec((tm, H), lambda i, f: (i, 0)),
        out_shape=jax.ShapeDtypeStruct((M, H), out_dtype),
        scratch_shapes=[pltpu.VMEM((tm, H), jnp.float32)],
        compiler_params=pltpu.CompilerParams(
            dimension_semantics=("parallel", "arbitrary")),
    )(x, w1, b1.reshape(1, F), w2, b2.reshape(1, H))


# ----------------------------------------------------------------------------
# Residual add + LayerNorm (tiled over rows, f32 statistics, bf16 in/out)
# ----------------------------------------------------------------------------
def _add_ln_kernel(x_ref, r_ref, g_ref, b_ref, o_ref, *, eps):
    x = x_ref[...].astype(jnp.float32) + r_ref[...].astype(jnp.float32)
    mu = jnp.mean(x, axis=-1, keepdims=True)
    xc = x - mu
    var = jnp.mean(xc * xc, axis=-1, keepdims=True)
    y = xc * jax.lax.rsqrt(var + eps)
    o_ref[...] = (y * g_ref[...] + b_ref[...]).astype(o_ref.dtype)


def add_layernorm(x, res, gamma, beta, eps=1e-5, out_dtype=jnp.bfloat16, *, tm=1024):
    M, H = x.shape
    tm = _pick_tile(M, tm, 16)
    return pl.pallas_call(
        functools.partial(_add_ln_kernel, eps=eps),
        grid=(M // tm,),
        in_specs=[
            pl.BlockSpec((tm, H), lambda i: (i, 0)),
            pl.BlockSpec((tm, H), lambda i: (i, 0)),
            pl.BlockSpec((1, H), lambda i: (0, 0)),
            pl.BlockSpec((1, H), lambda i: (0, 0)),
        ],
        out_specs=pl.BlockSpec((tm, H), lambda i: (i, 0)),
        out_shape=jax.ShapeDtypeStruct((M, H), out_dtype),
        compiler_params=pltpu.CompilerParams(dimension_semantics=("parallel",)),
    )(x, res, gamma.reshape(1, H), beta.reshape(1, H))


# ----------------------------------------------------------------------------
# Flash-style multi-head attention.
#   * H-wide (lane-dense) q/k/v blocks, no head split/merge transposes in JAX.
#   * Mask built in-kernel from a (B,1,Lk) key-keep vector + causal iota; no dense
#     (B,Lq,Lk) mask is ever materialized in HBM.
#   * Online softmax with m/l/acc scratch; fully-masked causal blocks skip compute.
# ----------------------------------------------------------------------------
def _flash_attn_kernel(q_ref, k_ref, v_ref, kp_ref, o_ref,
                       m_scr, l_scr, acc_scr, *, nhead, dh, scale, causal, tq, tkv):
    qi = pl.program_id(1)
    ki = pl.program_id(2)

    @pl.when(ki == 0)
    def _():
        m_scr[...] = jnp.full_like(m_scr, -jnp.inf)
        l_scr[...] = jnp.zeros_like(l_scr)
        acc_scr[...] = jnp.zeros_like(acc_scr)

    # Additive mask from key padding (1, tkv) + optional causal (tq, tkv).
    kp = kp_ref[0]                                       # (1, tkv) f32, 1 = keep
    mask_add = (1.0 - kp) * NEG_INF
    if causal:
        row = qi * tq + jax.lax.broadcasted_iota(jnp.int32, (tq, tkv), 0)
        col = ki * tkv + jax.lax.broadcasted_iota(jnp.int32, (tq, tkv), 1)
        mask_add = mask_add + jnp.where(row >= col, 0.0, NEG_INF)

    q = (q_ref[0].astype(jnp.float32) * scale).astype(jnp.bfloat16)   # (tq, H)
    k = k_ref[0].astype(jnp.bfloat16)                                  # (tkv, H)
    v = v_ref[0].astype(jnp.bfloat16)                                  # (tkv, H)

    def _compute():
        for h in range(nhead):             # static unroll over heads
            q_h = q[:, h * dh:(h + 1) * dh]
            k_h = k[:, h * dh:(h + 1) * dh]
            v_h = v[:, h * dh:(h + 1) * dh]
            s = jax.lax.dot_general(q_h, k_h, (((1,), (1,)), ((), ())),
                                    preferred_element_type=jnp.float32)
            s = s + mask_add                # (tq, tkv)

            m_prev = m_scr[h]               # (tq, 1)
            l_prev = l_scr[h]               # (tq, 1)
            acc_prev = acc_scr[h]           # (tq, dh)

            m_new = jnp.maximum(m_prev, jnp.max(s, axis=-1, keepdims=True))
            alpha = jnp.exp(m_prev - m_new)
            p = jnp.exp(s - m_new)
            l_scr[h] = alpha * l_prev + jnp.sum(p, axis=-1, keepdims=True)
            acc_scr[h] = alpha * acc_prev + jnp.dot(p.astype(jnp.bfloat16), v_h,
                                                    preferred_element_type=jnp.float32)
            m_scr[h] = m_new

    if causal:
        # Skip KV blocks that lie entirely in the future of this query block.
        pl.when(ki * tkv < qi * tq + tq)(_compute)
    else:
        _compute()

    @pl.when(ki == pl.num_programs(2) - 1)
    def _():
        outs = [acc_scr[h] * pl.reciprocal(l_scr[h], approx=True)
                for h in range(nhead)]
        o_ref[0] = jnp.concatenate(outs, axis=-1).astype(o_ref.dtype)


def flash_attention(q, k, v, key_keep, nhead, *, causal=False,
                    out_dtype=jnp.bfloat16, tq=256, tkv=512):
    # q: (B, Lq, H)   k, v: (B, Lk, H)   key_keep: (B, 1, Lk) f32, 1 = keep
    B, Lq, H = q.shape
    Lk = k.shape[1]
    dh = H // nhead
    scale = 1.0 / (dh ** 0.5)
    tq = _pick_tile(Lq, tq, 16)
    tkv = _pick_tile(Lk, tkv, 128)
    grid = (B, Lq // tq, Lk // tkv)
    return pl.pallas_call(
        functools.partial(_flash_attn_kernel, nhead=nhead, dh=dh, scale=scale,
                          causal=causal, tq=tq, tkv=tkv),
        grid=grid,
        in_specs=[
            pl.BlockSpec((1, tq, H), lambda b, qi, ki: (b, qi, 0)),
            pl.BlockSpec((1, tkv, H), lambda b, qi, ki: (b, ki, 0)),
            pl.BlockSpec((1, tkv, H), lambda b, qi, ki: (b, ki, 0)),
            pl.BlockSpec((1, 1, tkv), lambda b, qi, ki: (b, 0, ki)),
        ],
        out_specs=pl.BlockSpec((1, tq, H), lambda b, qi, ki: (b, qi, 0)),
        out_shape=jax.ShapeDtypeStruct((B, Lq, H), out_dtype),
        scratch_shapes=[
            pltpu.VMEM((nhead, tq, 1), jnp.float32),
            pltpu.VMEM((nhead, tq, 1), jnp.float32),
            pltpu.VMEM((nhead, tq, dh), jnp.float32),
        ],
        compiler_params=pltpu.CompilerParams(
            dimension_semantics=("parallel", "parallel", "arbitrary")),
    )(q, k, v, key_keep)


# ----------------------------------------------------------------------------
# Transformer building blocks
# ----------------------------------------------------------------------------
def self_attention_block(x, key_keep, p, nhead, causal=False):
    B, L, H = x.shape
    qkv = linear(x.reshape(B * L, H), p["wqkv"], p["bqkv"]).reshape(B, L, 3 * H)
    q, k, v = qkv[..., :H], qkv[..., H:2 * H], qkv[..., 2 * H:]
    o = flash_attention(q, k, v, key_keep, nhead, causal=causal)
    return linear(o.reshape(B * L, H), p["wo"], p["bo"]).reshape(B, L, H)


def cross_attention_block(x, enc_out, key_keep, p, nhead):
    B, Lq, H = x.shape
    Lk = enc_out.shape[1]
    q = linear(x.reshape(B * Lq, H), p["wq"], p["bq"]).reshape(B, Lq, H)
    kv = linear(enc_out.reshape(B * Lk, H), p["wkv"], p["bkv"]).reshape(B, Lk, 2 * H)
    k, v = kv[..., :H], kv[..., H:]
    o = flash_attention(q, k, v, key_keep, nhead, causal=False)
    return linear(o.reshape(B * Lq, H), p["wo"], p["bo"]).reshape(B, Lq, H)


def encoder_layer(x, key_keep, p, nhead, act):
    B, L, H = x.shape
    attn = self_attention_block(x, key_keep, p["attn"], nhead, causal=False)
    x2 = add_layernorm(attn.reshape(B * L, H), x.reshape(B * L, H),
                       p["ln1_g"], p["ln1_b"])
    h = ffn(x2, p["w1"], p["b1"], p["w2"], p["b2"], act)
    x3 = add_layernorm(h, x2, p["ln2_g"], p["ln2_b"])
    return x3.reshape(B, L, H)


def decoder_layer(x, self_keep, enc_out, cross_keep, p, nhead, act):
    B, L, H = x.shape
    sa = self_attention_block(x, self_keep, p["self_attn"], nhead, causal=True)
    x1 = add_layernorm(sa.reshape(B * L, H), x.reshape(B * L, H),
                       p["ln1_g"], p["ln1_b"])
    ca = cross_attention_block(x1.reshape(B, L, H), enc_out, cross_keep,
                               p["cross_attn"], nhead)
    x2 = add_layernorm(ca.reshape(B * L, H), x1, p["ln2_g"], p["ln2_b"])
    h = ffn(x2, p["w1"], p["b1"], p["w2"], p["b2"], act)
    x3 = add_layernorm(h, x2, p["ln3_g"], p["ln3_b"])
    return x3.reshape(B, L, H)


def _key_keep(attention_mask):
    # (B, Lk) with 1 = keep  ->  (B, 1, Lk) f32 for in-kernel mask construction
    B, Lk = attention_mask.shape
    return attention_mask.astype(jnp.float32).reshape(B, 1, Lk)


def run_encoder(tok_emb, pos_emb, layers, input_ids, attention_mask, nhead, act="gelu"):
    B, L = input_ids.shape
    x = (jnp.take(tok_emb, input_ids, axis=0) + pos_emb[None, :L, :]).astype(jnp.bfloat16)
    key_keep = _key_keep(attention_mask)
    for lp in layers:
        x = encoder_layer(x, key_keep, lp, nhead, act=act)
    return x


def run_decoder(tok_emb, pos_emb, layers, dec_ids, dec_mask, enc_out, enc_mask,
                nhead, act="gelu"):
    B, L = dec_ids.shape
    x = (jnp.take(tok_emb, dec_ids, axis=0) + pos_emb[None, :L, :]).astype(jnp.bfloat16)
    self_keep = _key_keep(dec_mask)      # causality added inside the kernel
    cross_keep = _key_keep(enc_mask)
    for lp in layers:
        x = decoder_layer(x, self_keep, enc_out, cross_keep, lp, nhead, act=act)
    return x


def run_classifier(sent_vecs, sent_mask, layers, cls_w, cls_b, nhead):
    # nn.TransformerEncoder (post-LN, relu) with src_key_padding_mask, then Linear
    # TODO(synk): reference classifier may add positional encoding before the stack.
    B, S, H = sent_vecs.shape
    key_keep = _key_keep(sent_mask)
    x = sent_vecs
    for lp in layers:
        x = encoder_layer(x, key_keep, lp, nhead, act="relu")
    n_classes = cls_w.shape[1]
    return linear(x.reshape(B * S, H), cls_w, cls_b,
                  out_dtype=jnp.float32).reshape(B, S, n_classes)


# ----------------------------------------------------------------------------
# Deterministic parameter init (synthetic weights; no checkpoint load)
# ----------------------------------------------------------------------------
def _dense_bf16(key, fan_in, fan_out):
    return (0.02 * jax.random.normal(key, (fan_in, fan_out), jnp.float32)).astype(jnp.bfloat16)


def _init_self_attn(key, H):
    ks = jax.random.split(key, 2)
    return dict(wqkv=_dense_bf16(ks[0], H, 3 * H), bqkv=jnp.zeros((3 * H,), jnp.float32),
                wo=_dense_bf16(ks[1], H, H), bo=jnp.zeros((H,), jnp.float32))


def _init_cross_attn(key, H):
    ks = jax.random.split(key, 3)
    return dict(wq=_dense_bf16(ks[0], H, H), bq=jnp.zeros((H,), jnp.float32),
                wkv=_dense_bf16(ks[1], H, 2 * H), bkv=jnp.zeros((2 * H,), jnp.float32),
                wo=_dense_bf16(ks[2], H, H), bo=jnp.zeros((H,), jnp.float32))


def _init_enc_layer(key, H, F):
    ks = jax.random.split(key, 3)
    return dict(attn=_init_self_attn(ks[0], H),
                ln1_g=jnp.ones((H,), jnp.float32), ln1_b=jnp.zeros((H,), jnp.float32),
                w1=_dense_bf16(ks[1], H, F), b1=jnp.zeros((F,), jnp.float32),
                w2=_dense_bf16(ks[2], F, H), b2=jnp.zeros((H,), jnp.float32),
                ln2_g=jnp.ones((H,), jnp.float32), ln2_b=jnp.zeros((H,), jnp.float32))


def _init_dec_layer(key, H, F):
    ks = jax.random.split(key, 4)
    return dict(self_attn=_init_self_attn(ks[0], H), cross_attn=_init_cross_attn(ks[1], H),
                ln1_g=jnp.ones((H,), jnp.float32), ln1_b=jnp.zeros((H,), jnp.float32),
                ln2_g=jnp.ones((H,), jnp.float32), ln2_b=jnp.zeros((H,), jnp.float32),
                w1=_dense_bf16(ks[2], H, F), b1=jnp.zeros((F,), jnp.float32),
                w2=_dense_bf16(ks[3], F, H), b2=jnp.zeros((H,), jnp.float32),
                ln3_g=jnp.ones((H,), jnp.float32), ln3_b=jnp.zeros((H,), jnp.float32))


def init_params(key, vocab, H, F, nhead, n_enc, n_dec, n_cls, n_classes, max_len):
    ks = jax.random.split(key, 6 + n_enc + n_dec + n_cls)
    i = 0
    tok_emb = (0.02 * jax.random.normal(ks[i], (vocab, H), jnp.float32)).astype(jnp.bfloat16); i += 1
    enc_pos = (0.02 * jax.random.normal(ks[i], (max_len, H), jnp.float32)).astype(jnp.bfloat16); i += 1
    dec_pos = (0.02 * jax.random.normal(ks[i], (max_len, H), jnp.float32)).astype(jnp.bfloat16); i += 1
    enc_layers = [_init_enc_layer(ks[i + j], H, F) for j in range(n_enc)]; i += n_enc
    dec_layers = [_init_dec_layer(ks[i + j], H, F) for j in range(n_dec)]; i += n_dec
    cls_layers = [_init_enc_layer(ks[i + j], H, F) for j in range(n_cls)]; i += n_cls
    cls_w = _dense_bf16(ks[i], H, n_classes); i += 1
    return dict(tok_emb=tok_emb, enc_pos=enc_pos, dec_pos=dec_pos,
                enc_layers=enc_layers, dec_layers=dec_layers,
                cls_layers=cls_layers, cls_w=cls_w,
                cls_b=jnp.zeros((n_classes,), jnp.float32),
                lm_b=jnp.zeros((vocab,), jnp.float32))


# ----------------------------------------------------------------------------
# ExAb forward
# ----------------------------------------------------------------------------
def exab_forward(params, src_ext_input_ids, src_ext_attention_mask,
                 src_abs_input_ids, src_abs_attention_mask,
                 decoder_input_ids, decoder_attention_mask,
                 sent_rep_ids, sent_rep_mask, *, nhead):
    # 1) word_vectors = self.encoder(src_ext)[0]   (shared seq2seq encoder)
    word_vectors = run_encoder(params["tok_emb"], params["enc_pos"], params["enc_layers"],
                               src_ext_input_ids, src_ext_attention_mask, nhead)

    # 2) logits = self.model(src_abs, decoder_input_ids).logits   (full seq2seq + LM head)
    enc_out = run_encoder(params["tok_emb"], params["enc_pos"], params["enc_layers"],
                          src_abs_input_ids, src_abs_attention_mask, nhead)
    dec_out = run_decoder(params["tok_emb"], params["dec_pos"], params["dec_layers"],
                          decoder_input_ids, decoder_attention_mask,
                          enc_out, src_abs_attention_mask, nhead)
    B, Ld, H = dec_out.shape
    logits = lm_head(dec_out.reshape(B * Ld, H), params["tok_emb"],
                     params["lm_b"]).reshape(B, Ld, -1)

    # 3) Pooling (sent_rep_tokens): gather hidden states at sentence-rep positions
    sent_vecs = jnp.take_along_axis(word_vectors, sent_rep_ids[..., None], axis=1)
    sent_vecs = sent_vecs * sent_rep_mask[..., None].astype(sent_vecs.dtype)
    sent_mask = sent_rep_mask

    # 4) TransformerEncoderClassifier on the pooled sentence vectors
    cls_logits = run_classifier(sent_vecs, sent_mask, params["cls_layers"],
                                params["cls_w"], params["cls_b"], nhead)
    return cls_logits, logits


# ----------------------------------------------------------------------------
# Demo
# ----------------------------------------------------------------------------
if __name__ == "__main__":
    B, L_ext, L_abs, L_dec, n_sent = 2, 16, 16, 8, 4
    vocab, H, nhead, ffn_dim, n_classes = 128, 32, 4, 64, 2
    n_enc_layers = n_dec_layers = n_cls_layers = 1

    root = jax.random.PRNGKey(0)
    pkey, dkey = jax.random.split(root)
    params = init_params(pkey, vocab, H, ffn_dim, nhead,
                         n_enc_layers, n_dec_layers, n_cls_layers, n_classes, max_len=32)

    ks = jax.random.split(dkey, 4)
    src_ext_input_ids = jax.random.randint(ks[0], (B, L_ext), 0, vocab, dtype=jnp.int32)
    src_ext_attention_mask = jnp.ones((B, L_ext), jnp.int32).at[:, 12:].set(0)
    src_abs_input_ids = jax.random.randint(ks[1], (B, L_abs), 0, vocab, dtype=jnp.int32)
    src_abs_attention_mask = jnp.ones((B, L_abs), jnp.int32)
    decoder_input_ids = jax.random.randint(ks[2], (B, L_dec), 0, vocab, dtype=jnp.int32)
    decoder_attention_mask = jnp.ones((B, L_dec), jnp.int32)
    sent_rep_ids = jnp.sort(jax.random.randint(ks[3], (B, n_sent), 0, 12, dtype=jnp.int32), axis=-1)
    sent_rep_mask = jnp.array([[1, 1, 1, 0], [1, 1, 0, 0]], jnp.int32)

    cls_logits, logits = exab_forward(
        params, src_ext_input_ids, src_ext_attention_mask,
        src_abs_input_ids, src_abs_attention_mask,
        decoder_input_ids, decoder_attention_mask,
        sent_rep_ids, sent_rep_mask, nhead=nhead)

    jax.block_until_ready((cls_logits, logits))
    assert cls_logits.shape == (B, n_sent, n_classes)
    assert logits.shape == (B, L_dec, vocab)
    assert bool(jnp.all(jnp.isfinite(cls_logits))) and bool(jnp.all(jnp.isfinite(logits)))
    print("KERNEL_OK")
</pallas_src>

<mosaic_0001>
module attributes {stable_mosaic.version = 11 : i64} {
  func.func @_matmul_kernel(%arg0: i32, %arg1: i32, %arg2: i32, %arg3: memref<32x32xbf16, #tpu.memory_space<vmem>>, %arg4: memref<32x96xbf16, #tpu.memory_space<vmem>>, %arg5: memref<1x96xf32, #tpu.memory_space<vmem>>, %arg6: memref<32x96xbf16, #tpu.memory_space<vmem>>, %arg7: memref<32x96xf32, #tpu.memory_space<vmem>>) attributes {dimension_semantics = [#tpu.dimension_semantics<parallel>, #tpu.dimension_semantics<parallel>, #tpu.dimension_semantics<arbitrary>], iteration_bounds = array<i64: 1, 1, 1>, scalar_prefetch = 0 : i64, scratch_operands = 1 : i64, tpu.core_type = #tpu.core_type<tc>, window_params = [{transform_indices = @transform_0, window_bounds = array<i64: 32, 32>}, {transform_indices = @transform_1, window_bounds = array<i64: 32, 96>}, {transform_indices = @transform_2, window_bounds = array<i64: 1, 96>}, {transform_indices = @transform_3, window_bounds = array<i64: 32, 96>}]} {
    %c0_i32 = arith.constant 0 : i32
    %0 = arith.cmpi eq, %arg2, %c0_i32 : i32
    %1 = arith.extui %0 : i1 to i32
    %c0_i32_0 = arith.constant 0 : i32
    %2 = arith.cmpi ne, %1, %c0_i32_0 : i32
    scf.if %2 {
      %cst_10 = arith.constant 0.000000e+00 : f32
      %12 = vector.broadcast %cst_10 : f32 to vector<32x96xf32>
      %c0_11 = arith.constant 0 : index
      %c0_12 = arith.constant 0 : index
      %13 = vector.load %arg7[%c0_11, %c0_12] : memref<32x96xf32, #tpu.memory_space<vmem>>, vector<32x96xf32>
      tpu.vector_store %arg7[%c0_11, %c0_12], %12 {strides = array<i32>} : memref<32x96xf32, #tpu.memory_space<vmem>>, vector<32x96xf32>,
    } else {
    }
    %c0 = arith.constant 0 : index
    %c0_1 = arith.constant 0 : index
    %3 = vector.load %arg7[%c0, %c0_1] : memref<32x96xf32, #tpu.memory_space<vmem>>, vector<32x96xf32>
    %c0_2 = arith.constant 0 : index
    %c0_3 = arith.constant 0 : index
    %4 = vector.load %arg3[%c0_2, %c0_3] : memref<32x32xbf16, #tpu.memory_space<vmem>>, vector<32x32xbf16>
    %c0_4 = arith.constant 0 : index
    %c0_5 = arith.constant 0 : index
    %5 = vector.load %arg4[%c0_4, %c0_5] : memref<32x96xbf16, #tpu.memory_space<vmem>>, vector<32x96xbf16>
    %cst = arith.constant dense<0.000000e+00> : vector<32x96xf32>
    %6 = tpu.matmul %4, %5, %cst {dimension_numbers = #tpu.dot_dimension_numbers<[1], [0], [0], [1], [0, 0, 1, 1], [], []>} : vector<32x32xbf16>, vector<32x96xbf16>, vector<32x96xf32> -> vector<32x96xf32>
    %7 = arith.addf %3, %6 : vector<32x96xf32>
    %c0_6 = arith.constant 0 : index
    %c0_7 = arith.constant 0 : index
    %8 = vector.load %arg7[%c0_6, %c0_7] : memref<32x96xf32, #tpu.memory_space<vmem>>, vector<32x96xf32>
    tpu.vector_store %arg7[%c0_6, %c0_7], %7 {strides = array<i32>} : memref<32x96xf32, #tpu.memory_space<vmem>>, vector<32x96xf32>,
    %c0_i32_8 = arith.constant 0 : i32
    %9 = arith.cmpi eq, %arg2, %c0_i32_8 : i32
    %10 = arith.extui %9 : i1 to i32
    %c0_i32_9 = arith.constant 0 : i32
    %11 = arith.cmpi ne, %10, %c0_i32_9 : i32
    scf.if %11 {
      %c0_10 = arith.constant 0 : index
      %c0_11 = arith.constant 0 : index
      %12 = vector.load %arg7[%c0_10, %c0_11] : memref<32x96xf32, #tpu.memory_space<vmem>>, vector<32x96xf32>
      %c0_12 = arith.constant 0 : index
      %c0_13 = arith.constant 0 : index
      %13 = vector.load %arg5[%c0_12, %c0_13] : memref<1x96xf32, #tpu.memory_space<vmem>>, vector<1x96xf32>
      %14 = vector.broadcast %13 : vector<1x96xf32> to vector<32x96xf32>
      %15 = arith.addf %12, %14 : vector<32x96xf32>
      %16 = arith.truncf %15 : vector<32x96xf32> to vector<32x96xbf16>
      %c0_14 = arith.constant 0 : index
      %c0_15 = arith.constant 0 : index
      %17 = vector.load %arg6[%c0_14, %c0_15] : memref<32x96xbf16, #tpu.memory_space<vmem>>, vector<32x96xbf16>
      tpu.vector_store %arg6[%c0_14, %c0_15], %16 {strides = array<i32>} : memref<32x96xbf16, #tpu.memory_space<vmem>>, vector<32x96xbf16>,
    } else {
    }
    return
  }
  func.func @transform_0(%arg0: i32, %arg1: i32, %arg2: i32) -> (i32, i32) {
    %c0_i32 = arith.constant 0 : i32
    return %arg0, %arg2 : i32, i32
  }
  func.func @transform_1(%arg0: i32, %arg1: i32, %arg2: i32) -> (i32, i32) {
    %c0_i32 = arith.constant 0 : i32
    return %arg2, %arg1 : i32, i32
  }
  func.func @transform_2(%arg0: i32, %arg1: i32, %arg2: i32) -> (i32, i32) {
    %c0_i32 = arith.constant 0 : i32
    %c0_i32_0 = arith.constant 0 : i32
    return %c0_i32, %arg1 : i32, i32
  }
  func.func @transform_3(%arg0: i32, %arg1: i32, %arg2: i32) -> (i32, i32) {
    %c0_i32 = arith.constant 0 : i32
    return %arg0, %arg1 : i32, i32
  }
}

</mosaic_0001>

<bundles_post_ra>
// kernel: tpu_custom_call.1
= control target key start
LH: loop header
LB: loop body
LE: loop exit
PB: predicated region body
PF: predicated region fallthrough
CT: control target
= control target key end

     0   :  { %8 = vsyncpa [#allocation4], 0  ;;  %s338_s0 = inlined_call_operand.hbm [shape: bf16[32,32], index: 0, kind: input, shape index: {}]   ;;  %s339_s1 = inlined_call_operand.hbm [shape: bf16[32,96], index: 1, kind: input, shape index: {}]   ;;  %s340_s2 = inlined_call_operand.vmem [shape: f32[1,96], index: 2, kind: input, shape index: {}]   ;;  %s341_s3 = inlined_call_operand.hbm [shape: bf16[32,96], index: 3, kind: output, shape index: {}]  }
   0x1   :  { %9 = vsyncpa [#allocation7], 0 }
   0x2   :  { %10 = vsyncpa [#allocation5], 0  ;;  %s15_s14 = sshll.u32 %s338_s0, 4  ;;  %s279_s15 = smov [#allocation3]   ;;  %s16_s14 = int_to_ptr.hbm [resolvable:$true] %s15_s14 }
   0x3   :  { %s17_s16 = sshll.u32 %s279_s15, 4  ;;  %s28_s19 = sshll.u32 %s339_s1, 4  ;;  %s18_s16 = int_to_ptr.vmem [resolvable:$true] %s17_s16  ;;  %s29_s19 = int_to_ptr.hbm [resolvable:$true] %s28_s19 }
   0x4   :  { %s280_s20 = smov 64   ;;  %s281_s21 = smov 4  }
   0x5   :  { %23 = dma.hbm_to_vmem [thread:$0]  %s16_s14, 256, %s18_s16, [#allocation4], %s280_s20, %s280_s20, %s281_s21  }
   0x6   :  { %s282_s22 = smov [#allocation6]  }
   0x7   :  { %s30_s23 = sshll.u32 %s282_s22, 4  ;;  %s31_s23 = int_to_ptr.vmem [resolvable:$true] %s30_s23 }
   0x8   :  { %36 = dma.hbm_to_vmem [thread:$0]  %s29_s19, 256, %s31_s23, [#allocation7], %s280_s20, %s280_s20, %s281_s21  }
   0x9   :  { %273 = dma.done.wait [#allocation4], 256  }
   0xa   :  { %274 = vsyncadd [#allocation4], 4294967040 }
   0xb   :  { %275 = dma.done.wait [#allocation7], 256  }
   0xc   :  { %276 = vsyncadd [#allocation7], 4294967040  ;;  %vm52_vm0 = vcmask 785408   ;;  %v283_v0 = vmov 0.0   ;;  %v191_v1 = vld [vmem:[#allocation6 + $0x8] sm:$0xff]  ;;  %v190_v2 = vld [vmem:[#allocation6] sm:$0xff] }
   0xd   :  { %53 = vst.msk [vmem:[#allocation2] sm:$0xff] %vm52_vm0, %v283_v0  ;;  %104 = vmatpush.bf16.msra.mxu0 %v191_v1  ;;  %192 = vmatpush.bf16.msra.mxu1 %v191_v1  ;;  %v188_v3 = vld [vmem:[#allocation3] sm:$0xff]  ;;  %v189_v4 = vld [vmem:[#allocation3 + $0x8] sm:$0xff]  ;;  %vm91_vm1 = vcmask 261120   ;;  %vm145_vm2 = vcmask 781312   ;;  %s156_s27 = sshll.u32 %s341_s3, 4  ;;  %s157_s27 = int_to_ptr.hbm [resolvable:$true] %s156_s27 }
   0xe   :  { %54 = vst.msk [vmem:[#allocation2 + $0x8] sm:$0xff] %vm52_vm0, %v283_v0  ;;  %v200_v13 = vld [vmem:[%s340_s2] ss:$0 sm:$0xff]  ;;  %s284_s2 = smov [#allocation8]  }
   0xf   :  { %55 = vst.msk [vmem:[#allocation2 + $0x10] sm:$0xff] %vm52_vm0, %v283_v0  ;;  %s154_s24 = sshll.u32 %s284_s2, 4  ;;  %s155_s24 = int_to_ptr.vmem [resolvable:$true] %s154_s24 }
  0x10   :  { %56 = vst.msk [vmem:[#allocation2 + $0x18] sm:$0xff] %vm52_vm0, %v283_v0 }
  0x11   :  { %105 = vmatpush.bf16.msra.mxu0 %v190_v2  ;;  %193 = vmatpush.bf16.msra.mxu1 %v190_v2 }
  0x14   :  { %186 = vmatmul.msk.bf16.vlgmr.msra.gmra.mxu0 %vm91_vm1, %v188_v3  ;;  %187 = vmatmul.msk.bf16.vlgmr.msra.gmra.mxu1 %vm91_vm1, %v189_v4  ;;  %v57_v5 = vld [vmem:[#allocation2] sm:$0xff] }
  0x15   :  { %v58_v11 = vld [vmem:[#allocation2 + $0x8] sm:$0xff] }
  0x16   :  { %v59_v6 = vld [vmem:[#allocation2 + $0x10] sm:$0xff] }
  0x17   :  { %v60_v12 = vld [vmem:[#allocation2 + $0x18] sm:$0xff] }
  0x91   :  { %v107_v7 = vpop.f32.mrf.mxu0  ;;  %v112_v8 = vpop.f32.mrf.mxu1 }
  0x92   :  { %v117_v9 = vadd.f32 %v107_v7, %v57_v5  ;;  %v119_v10 = vadd.f32 %v112_v8, %v59_v6 }
  0x94   :  { %122 = vst.msk [vmem:[#allocation2] sm:$0xff] %vm52_vm0, %v117_v9 }
  0x95   :  { %124 = vst.msk [vmem:[#allocation2 + $0x10] sm:$0xff] %vm52_vm0, %v119_v10 }
  0x99   :  { %v109_v14 = vpop.f32.mrf.mxu0  ;;  %v114_v15 = vpop.f32.mrf.mxu1 }
  0x9a   :  { %v118_v16 = vadd.f32 %v109_v14, %v58_v11  ;;  %v120_v17 = vadd.f32 %v114_v15, %v60_v12 }
  0x9b   :  { %v129_v18 = vld [vmem:[#allocation2] sm:$0xff] }
  0x9c   :  { %123 = vst.msk [vmem:[#allocation2 + $0x8] sm:$0xff] %vm52_vm0, %v118_v16  ;;  %v131_v19 = vld [vmem:[#allocation2 + $0x10] sm:$0xff]  ;;  %v137_v20 = vadd.f32 %v200_v13, %v129_v18 }
  0x9d   :  { %125 = vst.msk [vmem:[#allocation2 + $0x18] sm:$0xff] %vm52_vm0, %v120_v17  ;;  %v139_v21 = vadd.f32 %v200_v13, %v131_v19 }
  0x9e   :  { %v141_v22 = vpack.c.bf16 %v137_v20, %v137_v20 }
  0x9f   :  { %v143_v23 = vpack.c.bf16 %v139_v21, %v139_v21 }
  0xa0   :  { %146 = vst.msk [vmem:[#allocation8] sm:$0xf] %vm145_vm2, %v141_v22 }
  0xa1   :  { %148 = vst.msk [vmem:[#allocation8 + $0x8] sm:$0xf] %vm145_vm2, %v143_v23 }
  0xa3   :  { %v130_v24 = vld [vmem:[#allocation2 + $0x8] sm:$0xff] }
  0xa4   :  { %v132_v25 = vld [vmem:[#allocation2 + $0x18] sm:$0xff]  ;;  %v138_v26 = vadd.f32 %v200_v13, %v130_v24 }
  0xa5   :  { %v140_v27 = vadd.f32 %v200_v13, %v132_v25 }
  0xa6   :  { %v142_v28 = vpack.c.bf16 %v138_v26, %v138_v26 }
  0xa7   :  { %v144_v29 = vpack.c.bf16 %v140_v27, %v140_v27 }
  0xa8   :  { %147 = vst.msk [vmem:[#allocation8 + $0x4] sm:$0xf] %vm145_vm2, %v142_v28 }
  0xa9   :  { %149 = vst.msk [vmem:[#allocation8 + $0xc] sm:$0xf] %vm145_vm2, %v144_v29 }
  0xaa   :  { %162 = dma.vmem_to_hbm [thread:$0]  %s155_s24, 256, %s157_s27, [#allocation5], %s280_s20, %s280_s20, %s281_s21  }
  0xab   :  { %277 = dma.done.wait [#allocation5], 256  }
  0xac   :  { %278 = vsyncadd [#allocation5], 4294967040 }
  0xad   :  { %167 = vsyncpa [#allocation4], 1 }
  0xae   :  { %168 = vsyncpa [#allocation7], 1 }
  0xaf   :  { %169 = vsyncpa [#allocation5], 1 }

</bundles_post_ra>
